<compile_context>
chip_gen: v7x
topology: tpu7x:2x2x1
jax: 0.10.0
libtpu: 0.0.40
codegen_flags: <defaults>
</compile_context>

<pallas_src>
import jax
import jax.numpy as jnp
from jax.experimental import pallas as pl
from jax.experimental.pallas import tpu as pltpu

EPS_BN = 1e-5
EPS_NORM = 1e-12

# Tile sizes: multiples of 128 (MXU/lane friendly). For large N on v7x prefer
# 256; 128 keeps VMEM well under the 32 MiB default scoped limit on all gens.
TM = 128
TK = 128
VMEM_LIMIT = 48 * 1024 * 1024  # explicit scoped-VMEM budget (safe on v5e..v7x)


# ----------------------------------------------------------------------------
# Kernel 1: XW = X @ W   (row-tiled, bf16 MXU inputs, f32 accumulate)
# ----------------------------------------------------------------------------
def xw_kernel(x_ref, w_ref, o_ref):
    o_ref[...] = jnp.dot(
        x_ref[...].astype(jnp.bfloat16), w_ref[...],
        preferred_element_type=jnp.float32).astype(o_ref.dtype)


def xw_matmul(x, w_bf16, *, tm=TM):
    npad, f_in = x.shape
    f_out = w_bf16.shape[1]
    return pl.pallas_call(
        xw_kernel,
        out_shape=jax.ShapeDtypeStruct((npad, f_out), jnp.bfloat16),
        grid_spec=pltpu.PrefetchScalarGridSpec(
            num_scalar_prefetch=0,
            grid=(npad // tm,),
            in_specs=[
                pl.BlockSpec((tm, f_in), lambda i: (i, 0)),
                pl.BlockSpec((f_in, f_out), lambda i: (0, 0)),
            ],
            out_specs=pl.BlockSpec((tm, f_out), lambda i: (i, 0)),
        ),
        compiler_params=pltpu.CompilerParams(
            dimension_semantics=("parallel",),
            vmem_limit_bytes=VMEM_LIMIT),
    )(x, w_bf16)


# ----------------------------------------------------------------------------
# Kernel 2: GCN propagation  relu( A_hat @ XW + b_folded )   (layers 1-3)
# ----------------------------------------------------------------------------
def gcn_prop_kernel(a_ref, xw_ref, b_ref, o_ref, acc_ref):
    k = pl.program_id(1)

    @pl.when(k == 0)
    def _():
        acc_ref[...] = jnp.zeros_like(acc_ref)

    acc_ref[...] += jnp.dot(a_ref[...], xw_ref[...],
                            preferred_element_type=jnp.float32)

    @pl.when(k == pl.num_programs(1) - 1)
    def _():
        o_ref[...] = jnp.maximum(acc_ref[...] + b_ref[...], 0.0)


def gcn_propagate(a_bf16, xw_bf16, bias_row, *, tm=TM, tk=TK):
    npad = a_bf16.shape[0]
    f_out = xw_bf16.shape[1]
    return pl.pallas_call(
        gcn_prop_kernel,
        out_shape=jax.ShapeDtypeStruct((npad, f_out), jnp.float32),
        grid_spec=pltpu.PrefetchScalarGridSpec(
            num_scalar_prefetch=0,
            grid=(npad // tm, npad // tk),
            in_specs=[
                pl.BlockSpec((tm, tk), lambda i, k: (i, k)),    # A_hat tile
                pl.BlockSpec((tk, f_out), lambda i, k: (k, 0)),  # XW tile
                pl.BlockSpec((1, f_out), lambda i, k: (0, 0)),   # folded bias
            ],
            out_specs=pl.BlockSpec((tm, f_out), lambda i, k: (i, 0)),
            scratch_shapes=[pltpu.VMEM((tm, f_out), jnp.float32)],
        ),
        compiler_params=pltpu.CompilerParams(
            dimension_semantics=("parallel", "arbitrary"),
            vmem_limit_bytes=VMEM_LIMIT),
    )(a_bf16, xw_bf16, bias_row)


# ----------------------------------------------------------------------------
# Kernel 3: fused conv4 propagation + global_max_pool + FC head + L2 normalize
# ----------------------------------------------------------------------------
def conv4_pool_head_kernel(a_ref, xw_ref, b4_ref, maskt_ref,
                           w1_ref, b1_ref, w2_ref, b2_ref, w3_ref, b3_ref,
                           o_ref, acc_ref, pooled_ref):
    i = pl.program_id(0)
    k = pl.program_id(1)
    last_i = pl.num_programs(0) - 1
    last_k = pl.num_programs(1) - 1

    @pl.when(jnp.logical_and(i == 0, k == 0))
    def _():
        pooled_ref[...] = jnp.full_like(pooled_ref, -jnp.inf)

    @pl.when(k == 0)
    def _():
        acc_ref[...] = jnp.zeros_like(acc_ref)

    acc_ref[...] += jnp.dot(a_ref[...], xw_ref[...],
                            preferred_element_type=jnp.float32)

    @pl.when(k == last_k)
    def _():
        # layer-4 activation for this row tile, then running per-graph max.
        h = jnp.maximum(acc_ref[...] + b4_ref[...], 0.0)       # (tm, 1024)
        maskt = maskt_ref[...]                                  # (tm, G)
        num_graphs = maskt.shape[1]
        for g in range(num_graphs):                             # G small, static
            mcol = maskt[:, g:g + 1]                            # (tm, 1)
            masked = jnp.where(mcol > 0.5, h, -jnp.inf)
            row = jnp.max(masked, axis=0, keepdims=True)        # (1, 1024)
            pooled_ref[g:g + 1, :] = jnp.maximum(pooled_ref[g:g + 1, :], row)

    @pl.when(jnp.logical_and(i == last_i, k == last_k))
    def _():
        p = pooled_ref[...]                                     # (G, 1024)
        h1 = jnp.maximum(
            jnp.dot(p, w1_ref[...], preferred_element_type=jnp.float32)
            + b1_ref[...], 0.0)
        h2 = jnp.maximum(
            jnp.dot(h1, w2_ref[...], preferred_element_type=jnp.float32)
            + b2_ref[...], 0.0)
        h3 = jnp.dot(h2, w3_ref[...], preferred_element_type=jnp.float32) \
            + b3_ref[...]
        # F.normalize(p=2, dim=1) via rsqrt (EUP) instead of sqrt + divide.
        inv = jax.lax.rsqrt(
            jnp.maximum(jnp.sum(h3 * h3, axis=1, keepdims=True),
                        EPS_NORM * EPS_NORM))
        o_ref[...] = h3 * inv


def conv4_pool_head(a_bf16, xw4, b4_row, maskt,
                    w1, b1_row, w2, b2_row, w3, b3_row, *, tm=TM, tk=TK):
    npad = a_bf16.shape[0]
    fo = xw4.shape[1]
    num_graphs = maskt.shape[1]
    d1 = w1.shape[1]
    d2 = w2.shape[1]
    emb = w3.shape[1]
    return pl.pallas_call(
        conv4_pool_head_kernel,
        out_shape=jax.ShapeDtypeStruct((num_graphs, emb), jnp.float32),
        grid_spec=pltpu.PrefetchScalarGridSpec(
            num_scalar_prefetch=0,
            grid=(npad // tm, npad // tk),
            in_specs=[
                pl.BlockSpec((tm, tk), lambda i, k: (i, k)),          # A_hat
                pl.BlockSpec((tk, fo), lambda i, k: (k, 0)),          # XW4
                pl.BlockSpec((1, fo), lambda i, k: (0, 0)),           # b4'
                pl.BlockSpec((tm, num_graphs), lambda i, k: (i, 0)),  # mask^T
                pl.BlockSpec((fo, d1), lambda i, k: (0, 0)),          # fc1 W'
                pl.BlockSpec((1, d1), lambda i, k: (0, 0)),           # fc1 b'
                pl.BlockSpec((d1, d2), lambda i, k: (0, 0)),          # fc2 W'
                pl.BlockSpec((1, d2), lambda i, k: (0, 0)),           # fc2 b'
                pl.BlockSpec((d2, emb), lambda i, k: (0, 0)),         # fc3 W
                pl.BlockSpec((1, emb), lambda i, k: (0, 0)),          # fc3 b
            ],
            out_specs=pl.BlockSpec((num_graphs, emb), lambda i, k: (0, 0)),
            scratch_shapes=[pltpu.VMEM((tm, fo), jnp.float32),
                            pltpu.VMEM((num_graphs, fo), jnp.float32)],
        ),
        compiler_params=pltpu.CompilerParams(
            # pooled accumulator is carried across both grid axes -> arbitrary.
            dimension_semantics=("arbitrary", "arbitrary"),
            vmem_limit_bytes=VMEM_LIMIT),
    )(a_bf16, xw4, b4_row, maskt, w1, b1_row, w2, b2_row, w3, b3_row)


# ----------------------------------------------------------------------------
# Glue: normalized adjacency, BN folding, padding, parameter init, forward
# ----------------------------------------------------------------------------
def build_norm_adj(edge_index, num_nodes_pad):
    # A[i, j] = 1 iff edge j -> i (rows aggregate incoming messages).
    # NOTE: duplicate edges are deduped (PyG's scatter-add would count them).
    src, dst = edge_index[0], edge_index[1]
    a = jnp.zeros((num_nodes_pad, num_nodes_pad), jnp.float32)
    a = a.at[dst, src].set(1.0)
    a = a + jnp.eye(num_nodes_pad, dtype=jnp.float32)   # self-loops
    deg = jnp.sum(a, axis=1)
    dinv = jax.lax.rsqrt(jnp.maximum(deg, 1.0))
    return (dinv[:, None] * a * dinv[None, :]).astype(jnp.bfloat16)


def fold_bn(w, b, gamma, beta, mean, var):
    # Exact in eval mode: (xW + b - mean)*scale + beta == x(W*scale) + b'
    scale = gamma * jax.lax.rsqrt(var + EPS_BN)
    return w * scale[None, :], (b - mean) * scale + beta


def pad2(w, rows, cols):
    return jnp.zeros((rows, cols), w.dtype).at[:w.shape[0], :w.shape[1]].set(w)


def pad1(b, cols):
    return jnp.zeros((cols,), b.dtype).at[:b.shape[0]].set(b)


def init_params(key, num_node_features=6, emb_size=64):
    dims_gcn = [(num_node_features, 32), (32, 64), (64, 128), (128, 1024)]
    dims_fc = [(1024, 512), (512, 256), (256, emb_size)]
    params = {}
    keys = iter(jax.random.split(key, 64))

    def lin(fan_in, fan_out):
        scale = 1.0 / jnp.sqrt(jnp.float32(fan_in))
        w = jax.random.uniform(next(keys), (fan_in, fan_out), jnp.float32,
                               -scale, scale)
        b = jax.random.uniform(next(keys), (fan_out,), jnp.float32,
                               -scale, scale)
        return w, b

    def bn(f):
        gamma = jnp.ones((f,), jnp.float32)
        beta = jnp.zeros((f,), jnp.float32)
        mean = 0.1 * jax.random.normal(next(keys), (f,), jnp.float32)
        var = 1.0 + 0.1 * jax.random.uniform(next(keys), (f,), jnp.float32)
        return gamma, beta, mean, var

    for i, (fi, fo) in enumerate(dims_gcn, start=1):
        params[f"conv{i}"] = lin(fi, fo)
        params[f"bn{i}"] = bn(fo)
    for i, (fi, fo) in enumerate(dims_fc, start=1):
        params[f"fc{i}"] = lin(fi, fo)
    params["bn5"] = bn(512)
    params["bn6"] = bn(256)
    return params


def graphnet_forward(x, edge_index, batch, num_graphs, params,
                     *, tm=TM, tk=TK):
    n_real, f_in = x.shape
    tile = max(tm, tk)
    npad = ((n_real + tile - 1) // tile) * tile   # pad node count (exact: padded
                                                  # nodes only self-loop + masked)
    a_hat = build_norm_adj(edge_index, npad)

    # lane-dense (>=128) padded feature widths for the GCN stack
    pad_dims = [(128, 128), (128, 128), (128, 128), (128, 1024)]

    # padded node features (zero rows for padded nodes, zero extra columns)
    h = jnp.zeros((npad, pad_dims[0][0]), jnp.float32).at[:n_real, :f_in].set(x)

    xw4 = b4_row = None
    for li in range(4):
        w, b = params[f"conv{li + 1}"]
        gamma, beta, mean, var = params[f"bn{li + 1}"]
        wf, bf = fold_bn(w, b, gamma, beta, mean, var)
        fi_p, fo_p = pad_dims[li]
        wp = pad2(wf, fi_p, fo_p).astype(jnp.bfloat16)
        bp = pad1(bf, fo_p).reshape(1, fo_p)
        xw = xw_matmul(h, wp, tm=tm)                      # (npad, fo_p) bf16
        if li < 3:
            h = gcn_propagate(a_hat, xw, bp, tm=tm, tk=tk)
        else:
            xw4, b4_row = xw, bp                          # fused with the head

    # graph membership mask, transposed to (npad, G) so pooling needs no XLU
    maskt = (batch[:, None] == jnp.arange(num_graphs)[None, :]).astype(jnp.float32)
    maskt = jnp.zeros((npad, num_graphs), jnp.float32).at[:n_real].set(maskt)

    w1, b1 = params["fc1"]
    w1f, b1f = fold_bn(w1, b1, *params["bn5"])
    w2, b2 = params["fc2"]
    w2f, b2f = fold_bn(w2, b2, *params["bn6"])
    w3, b3 = params["fc3"]

    return conv4_pool_head(
        a_hat, xw4, b4_row, maskt,
        w1f, b1f.reshape(1, -1),
        w2f, b2f.reshape(1, -1),
        w3, b3.reshape(1, -1),
        tm=tm, tk=tk)


if __name__ == "__main__":
    key = jax.random.PRNGKey(0)
    k_param, k_x = jax.random.split(key)

    num_nodes = 16
    num_graphs = 2
    num_node_features = 6
    emb_size = 64

    # two 8-node undirected ring graphs
    edges = []
    for g in range(num_graphs):
        base = g * 8
        for i in range(8):
            u = base + i
            v = base + (i + 1) % 8
            edges.append((u, v))
            edges.append((v, u))
    edge_index = jnp.array(edges, dtype=jnp.int32).T               # (2, E)
    batch = jnp.repeat(jnp.arange(num_graphs, dtype=jnp.int32), 8)  # (N,)

    x = jax.random.normal(k_x, (num_nodes, num_node_features), jnp.float32)
    params = init_params(k_param, num_node_features, emb_size)

    out = graphnet_forward(x, edge_index, batch, num_graphs, params)
    out = jax.block_until_ready(out)
    assert out.shape == (num_graphs, emb_size)
    assert bool(jnp.all(jnp.isfinite(out)))
    print("KERNEL_OK")
</pallas_src>

<mosaic_0001>
module attributes {stable_mosaic.version = 11 : i64} {
  func.func @xw_kernel(%arg0: i32, %arg1: memref<128x128xf32, #tpu.memory_space<vmem>>, %arg2: memref<128x128xbf16, #tpu.memory_space<vmem>>, %arg3: memref<128x128xbf16, #tpu.memory_space<vmem>>) attributes {dimension_semantics = [#tpu.dimension_semantics<parallel>], iteration_bounds = array<i64: 1>, scalar_prefetch = 0 : i64, scratch_operands = 0 : i64, tpu.core_type = #tpu.core_type<tc>, window_params = [{transform_indices = @transform_0, window_bounds = array<i64: 128, 128>}, {pipeline_mode = #tpu.pipeline_mode<synchronous>, transform_indices = @transform_1, window_bounds = array<i64: 128, 128>}, {transform_indices = @transform_2, window_bounds = array<i64: 128, 128>}]} {
    %c0 = arith.constant 0 : index
    %c0_0 = arith.constant 0 : index
    %0 = vector.load %arg1[%c0, %c0_0] : memref<128x128xf32, #tpu.memory_space<vmem>>, vector<128x128xf32>
    %1 = arith.truncf %0 : vector<128x128xf32> to vector<128x128xbf16>
    %c0_1 = arith.constant 0 : index
    %c0_2 = arith.constant 0 : index
    %2 = vector.load %arg2[%c0_1, %c0_2] : memref<128x128xbf16, #tpu.memory_space<vmem>>, vector<128x128xbf16>
    %cst = arith.constant dense<0.000000e+00> : vector<128x128xf32>
    %3 = tpu.matmul %1, %2, %cst {dimension_numbers = #tpu.dot_dimension_numbers<[1], [0], [0], [1], [0, 0, 1, 1], [], []>} : vector<128x128xbf16>, vector<128x128xbf16>, vector<128x128xf32> -> vector<128x128xf32>
    %4 = arith.truncf %3 : vector<128x128xf32> to vector<128x128xbf16>
    %c0_3 = arith.constant 0 : index
    %c0_4 = arith.constant 0 : index
    %5 = vector.load %arg3[%c0_3, %c0_4] : memref<128x128xbf16, #tpu.memory_space<vmem>>, vector<128x128xbf16>
    tpu.vector_store %arg3[%c0_3, %c0_4], %4 {strides = array<i32>} : memref<128x128xbf16, #tpu.memory_space<vmem>>, vector<128x128xbf16>,
    return
  }
  func.func @transform_0(%arg0: i32) -> (i32, i32) {
    %c0_i32 = arith.constant 0 : i32
    %c0_i32_0 = arith.constant 0 : i32
    return %arg0, %c0_i32 : i32, i32
  }
  func.func @transform_1(%arg0: i32) -> (i32, i32) {
    %c0_i32 = arith.constant 0 : i32
    %c0_i32_0 = arith.constant 0 : i32
    %c0_i32_1 = arith.constant 0 : i32
    return %c0_i32, %c0_i32_0 : i32, i32
  }
  func.func @transform_2(%arg0: i32) -> (i32, i32) {
    %c0_i32 = arith.constant 0 : i32
    %c0_i32_0 = arith.constant 0 : i32
    return %arg0, %c0_i32 : i32, i32
  }
}

</mosaic_0001>

<bundles_post_ra>
// kernel: tpu_custom_call.1
= control target key start
LH: loop header
LB: loop body
LE: loop exit
PB: predicated region body
PF: predicated region fallthrough
CT: control target
= control target key end

     0   :  { %7 = vsyncpa [#allocation3], 0  ;;  %s626_s0 = inlined_call_operand.hbm [shape: f32[128,128], index: 0, kind: input, shape index: {}]   ;;  %s627_s1 = inlined_call_operand.hbm [shape: bf16[128,128], index: 1, kind: input, shape index: {}]   ;;  %s628_s2 = inlined_call_operand.hbm [shape: bf16[128,128], index: 2, kind: output, shape index: {}]  }
   0x1   :  { %8 = vsyncpa [#allocation6], 0 }
   0x2   :  { %9 = vsyncpa [#allocation4], 0  ;;  %s562_s9 = smov [#allocation2]   ;;  %s490_s13 = scalar_lea.hbm %s626_s0, 2048 }
   0x3   :  { %s15_s10 = sshll.u32 %s562_s9, 4  ;;  %p491_p0 = scmp.ne.s32.totalorder %s626_s0, %s490_s13  ;;  %s16_s10 = int_to_ptr.vmem [resolvable:$true] %s15_s10 }
   0x4   :  { %p494_p1 = scmp.lt.u32.totalorder %s490_s13, %s626_s0 }
   0x6   :  { %p496_p2 = pnand %p494_p1, %p491_p0 }
   0x8   :  { %499 = shalt.err (!%p496_p2)
}
   0x9   :  { %s500_s18 = scalar_lea.vmem %s16_s10, 2048  ;;  %p505_p4 = scmp.lt.s32.totalorder %s16_s10, %s16_s10 }
   0xa   :  { %p501_p3 = scmp.ne.s32.totalorder %s16_s10, %s500_s18  ;;  %p506_p5 = scmp.lt.s32.totalorder %s500_s18, %s500_s18 }
   0xc   :  { %p507_p6 = por %p506_p5, %p505_p4 }
   0xe   :  { %p508_p7 = pnand %p507_p6, %p501_p3 }
  0x10   :  { %511 = shalt.err (!%p508_p7)
}
  0x11   :  { %s563_s19 = smov 128   ;;  %s564_s20 = smov 8  }
  0x12   :  { %21 = dma.hbm_to_vmem [thread:$0]  %s626_s0, 2048, %s16_s10, [#allocation3], %s563_s19, %s563_s19, %s564_s20  }
  0x13   :  { %s565_s23 = smov [#allocation5]   ;;  %s512_s27 = scalar_lea.hbm %s627_s1, 1024 }
  0x14   :  { %s27_s24 = sshll.u32 %s565_s23, 4  ;;  %p513_p8 = scmp.ne.s32.totalorder %s627_s1, %s512_s27  ;;  %s28_s24 = int_to_ptr.vmem [resolvable:$true] %s27_s24 }
  0x15   :  { %p516_p9 = scmp.lt.u32.totalorder %s512_s27, %s627_s1 }
  0x17   :  { %p518_p10 = pnand %p516_p9, %p513_p8 }
  0x19   :  { %521 = shalt.err (!%p518_p10)
}
  0x1a   :  { %s522_s4 = scalar_lea.vmem %s28_s24, 1024  ;;  %p527_p12 = scmp.lt.s32.totalorder %s28_s24, %s28_s24 }
  0x1b   :  { %p523_p11 = scmp.ne.s32.totalorder %s28_s24, %s522_s4  ;;  %p528_p13 = scmp.lt.s32.totalorder %s522_s4, %s522_s4 }
  0x1d   :  { %p529_p0 = por %p528_p13, %p527_p12 }
  0x1f   :  { %p530_p1 = pnand %p529_p0, %p523_p11 }
  0x21   :  { %533 = shalt.err (!%p530_p1)
}
  0x22   :  { %s566_s0 = smov 64   ;;  %s567_s5 = smov 4  }
  0x23   :  { %33 = dma.hbm_to_vmem [thread:$0]  %s627_s1, 1024, %s28_s24, [#allocation6], %s566_s0, %s566_s0, %s567_s5  }
  0x24   :  { %556 = dma.done.wait [#allocation3], 2048  }
  0x25   :  { %557 = vsyncadd [#allocation3], 4294965248 }
  0x26   :  { %558 = dma.done.wait [#allocation6], 1024  }
  0x27   :  { %559 = vsyncadd [#allocation6], 4294966272  ;;  %v482_v0 = vld [vmem:[#allocation5] sm:$0xff]   ;;  %v483_v1 = vld [vmem:[#allocation5 + $0x8] sm:$0xff]   ;;  %s568_s1 = smov [#allocation7]  }
  0x28   :  { %427 = vmatprep.subr.bf16.mxu0 %v482_v0  ;;  %459 = vmatprep.subr.bf16.mxu1 %v482_v0  ;;  %v484_v2 = vld [vmem:[#allocation5 + $0x10] sm:$0xff]   ;;  %v485_v3 = vld [vmem:[#allocation5 + $0x18] sm:$0xff]   ;;  %v41_v4 = vld [vmem:[#allocation2] sm:$0xff]  ;;  %s311_s8 = sshll.u32 %s568_s1, 4  ;;  %s312_s8 = int_to_ptr.vmem [resolvable:$true] %s311_s8 }
  0x29   :  { %428 = vmatpush3.bf16.msra.mxu0 %v482_v0  ;;  %467 = vmatpush3.bf16.msra.mxu1 %v482_v0  ;;  %v42_v5 = vld [vmem:[#allocation2 + $0x8] sm:$0xff]  ;;  %v49_v6 = vld [vmem:[#allocation2 + $0x40] sm:$0xff]  ;;  %v488_v12 = vld [vmem:[#allocation5 + $0x30] sm:$0xff]   ;;  %s534_s9 = scalar_lea.vmem %s312_s8, 1024  ;;  %p539_p3 = scmp.lt.s32.totalorder %s312_s8, %s312_s8 }
  0x2a   :  { %429 = vmatprep.subr.bf16.mxu0 %v483_v1  ;;  %460 = vmatprep.subr.bf16.mxu1 %v483_v1  ;;  %v57_v7 = vpack.c.bf16 %v42_v5, %v41_v4  ;;  %v50_v8 = vld [vmem:[#allocation2 + $0x48] sm:$0xff]  ;;  %v486_v10 = vld [vmem:[#allocation5 + $0x20] sm:$0xff]   ;;  %v489_v13 = vld [vmem:[#allocation5 + $0x38] sm:$0xff]   ;;  %p535_p2 = scmp.ne.s32.totalorder %s312_s8, %s534_s9  ;;  %p540_p4 = scmp.lt.s32.totalorder %s534_s9, %s534_s9 }
  0x2b   :  { %v61_v9 = vpack.c.bf16 %v50_v8, %v49_v6  ;;  %v487_v11 = vld [vmem:[#allocation5 + $0x28] sm:$0xff]   ;;  %v43_v14 = vld [vmem:[#allocation2 + $0x10] sm:$0xff]  ;;  %v44_v15 = vld [vmem:[#allocation2 + $0x18] sm:$0xff] }
  0x2c   :  { %443 = vmatprep.mubr.bf16.mxu0 %v57_v7  ;;  %v51_v16 = vld [vmem:[#allocation2 + $0x50] sm:$0xff]  ;;  %v52_v17 = vld [vmem:[#allocation2 + $0x58] sm:$0xff]  ;;  %v45_v18 = vld [vmem:[#allocation2 + $0x20] sm:$0xff]  ;;  %v58_v22 = vpack.c.bf16 %v44_v15, %v43_v14  ;;  %p541_p5 = por %p540_p4, %p539_p3 }
  0x2d   :  { %430 = vmatpush3.bf16.msra.mxu0 %v483_v1  ;;  %468 = vmatpush3.bf16.msra.mxu1 %v483_v1  ;;  %v46_v19 = vld [vmem:[#allocation2 + $0x28] sm:$0xff]  ;;  %v53_v20 = vld [vmem:[#allocation2 + $0x60] sm:$0xff]  ;;  %v62_v23 = vpack.c.bf16 %v52_v17, %v51_v16  ;;  %v47_v26 = vld [vmem:[#allocation2 + $0x30] sm:$0xff] }
  0x2e   :  { %431 = vmatprep.subr.bf16.mxu0 %v484_v2  ;;  %461 = vmatprep.subr.bf16.mxu1 %v484_v2  ;;  %v54_v21 = vld [vmem:[#allocation2 + $0x68] sm:$0xff]  ;;  %v59_v24 = vpack.c.bf16 %v46_v19, %v45_v18  ;;  %v48_v27 = vld [vmem:[#allocation2 + $0x38] sm:$0xff]  ;;  %v55_v28 = vld [vmem:[#allocation2 + $0x70] sm:$0xff]  ;;  %p542_p6 = pnand %p541_p5, %p535_p2 }
  0x2f   :  { %451 = vmatprep.mubr.bf16.mxu1 %v61_v9  ;;  %v63_v25 = vpack.c.bf16 %v54_v21, %v53_v20  ;;  %v56_v29 = vld [vmem:[#allocation2 + $0x78] sm:$0xff]  ;;  %v60_v30 = vpack.c.bf16 %v48_v27, %v47_v26 }
  0x30   :  { %v64_v31 = vpack.c.bf16 %v56_v29, %v55_v28 }
  0x31   :  { %432 = vmatpush3.bf16.msra.mxu0 %v484_v2  ;;  %469 = vmatpush3.bf16.msra.mxu1 %v484_v2 }
  0x32   :  { %433 = vmatprep.subr.bf16.mxu0 %v485_v3  ;;  %462 = vmatprep.subr.bf16.mxu1 %v485_v3 }
  0x35   :  { %434 = vmatpush3.bf16.msra.mxu0 %v485_v3  ;;  %470 = vmatpush3.bf16.msra.mxu1 %v485_v3 }
  0x36   :  { %435 = vmatprep.subr.bf16.mxu0 %v486_v10  ;;  %463 = vmatprep.subr.bf16.mxu1 %v486_v10 }
  0x39   :  { %436 = vmatpush3.bf16.msra.mxu0 %v486_v10  ;;  %471 = vmatpush3.bf16.msra.mxu1 %v486_v10 }
  0x3a   :  { %437 = vmatprep.subr.bf16.mxu0 %v487_v11  ;;  %464 = vmatprep.subr.bf16.mxu1 %v487_v11 }
  0x3d   :  { %438 = vmatpush3.bf16.msra.mxu0 %v487_v11  ;;  %472 = vmatpush3.bf16.msra.mxu1 %v487_v11 }
  0x3e   :  { %439 = vmatprep.subr.bf16.mxu0 %v488_v12  ;;  %465 = vmatprep.subr.bf16.mxu1 %v488_v12 }
  0x41   :  { %440 = vmatpush3.bf16.msra.mxu0 %v488_v12  ;;  %473 = vmatpush3.bf16.msra.mxu1 %v488_v12 }
  0x42   :  { %441 = vmatprep.subr.bf16.mxu0 %v489_v13  ;;  %466 = vmatprep.subr.bf16.mxu1 %v489_v13 }
  0x45   :  { %442 = vmatpush3.bf16.msra.mxu0 %v489_v13  ;;  %474 = vmatpush3.bf16.msra.mxu1 %v489_v13 }
  0x48   :  { %444 = vmatmul.mubr.bf16.vlgmr.msra.gmra.mrb[0].mxu0 %v58_v22  ;;  %452 = vmatmul.mubr.bf16.vlgmr.msra.gmra.mrb[0].mxu1 %v62_v23 }
  0x49   :  { %447 = vmatprep.mubr.bf16.mxu0 %v59_v24  ;;  %455 = vmatprep.mubr.bf16.mxu1 %v63_v25 }
  0x50   :  { %448 = vmatmul.mubr.bf16.gmra.mrb[4].mxu0 %v60_v30  ;;  %456 = vmatmul.mubr.bf16.gmra.mrb[4].mxu1 %v64_v31 }
 0x11b   :  { %v445_v32 = vpop.f32.mrb[0].mxu0  ;;  %v453_v33 = vpop.f32.mrb[0].mxu1 }
 0x11c   :  { %v163_v34 = vpop.f32.mrb[1].mxu0  ;;  %v195_v35 = vpop.f32.mrb[1].mxu1 }
 0x11d   :  { %v446_v36 = vpop.f32.mrb[2].mxu0  ;;  %v454_v37 = vpop.f32.mrb[2].mxu1 }
 0x11e   :  { %v372_v38 = vpack.c.bf16 %v446_v36, %v445_v32  ;;  %v392_v39 = vpack.c.bf16 %v454_v37, %v453_v33  ;;  %v166_v40 = vpop.f32.mrb[3].mxu0  ;;  %v198_v41 = vpop.f32.mrb[3].mxu1 }
 0x11f   :  { %v367_v42 = vpack.c.bf16 %v166_v40, %v163_v34  ;;  %v387_v43 = vpack.c.bf16 %v198_v41, %v195_v35 }
 0x120   :  { %404 = vst [vmem:[#allocation7 + $0x8] sm:$0xff] %v372_v38   ;;  %408 = vst [vmem:[#allocation7 + $0x28] sm:$0xff] %v392_v39  }
 0x121   :  { %368 = vst [vmem:[#allocation7] sm:$0xff] %v367_v42   ;;  %407 = vst [vmem:[#allocation7 + $0x20] sm:$0xff] %v387_v43  }
 0x123   :  { %v449_v44 = vpop.f32.mrb[4].mxu0  ;;  %v457_v45 = vpop.f32.mrb[4].mxu1 }
 0x124   :  { %v179_v46 = vpop.f32.mrb[5].mxu0  ;;  %v211_v47 = vpop.f32.mrb[5].mxu1 }
 0x125   :  { %v450_v48 = vpop.f32.mrb[6].mxu0  ;;  %v458_v49 = vpop.f32.mrb[6].mxu1 }
 0x126   :  { %v382_v50 = vpack.c.bf16 %v450_v48, %v449_v44  ;;  %v402_v51 = vpack.c.bf16 %v458_v49, %v457_v45  ;;  %v182_v52 = vpop.f32.mrb[7].mxu0  ;;  %v214_v53 = vpop.f32.mrb[7].mxu1 }
 0x127   :  { %v377_v54 = vpack.c.bf16 %v182_v52, %v179_v46  ;;  %v397_v55 = vpack.c.bf16 %v214_v53, %v211_v47 }
 0x128   :  { %406 = vst [vmem:[#allocation7 + $0x18] sm:$0xff] %v382_v50   ;;  %410 = vst [vmem:[#allocation7 + $0x38] sm:$0xff] %v402_v51  }
 0x129   :  { %405 = vst [vmem:[#allocation7 + $0x10] sm:$0xff] %v377_v54   ;;  %409 = vst [vmem:[#allocation7 + $0x30] sm:$0xff] %v397_v55  }
 0x12a   :  { %545 = shalt.err (!%p542_p6)
}
 0x12b   :  { %s546_s12 = scalar_lea.hbm %s628_s2, 1024 }
 0x12c   :  { %p547_p7 = scmp.ne.s32.totalorder %s628_s2, %s546_s12  ;;  %p550_p8 = scmp.lt.u32.totalorder %s546_s12, %s628_s2 }
 0x12e   :  { %p552_p9 = pnand %p550_p8, %p547_p7 }
 0x130   :  { %555 = shalt.err (!%p552_p9)
}
 0x131   :  { %317 = dma.vmem_to_hbm [thread:$0]  %s312_s8, 1024, %s628_s2, [#allocation4], %s566_s0, %s566_s0, %s567_s5  }
 0x132   :  { %560 = dma.done.wait [#allocation4], 1024  }
 0x133   :  { %561 = vsyncadd [#allocation4], 4294966272 }
 0x134   :  { %321 = vsyncpa [#allocation3], 1 }
 0x135   :  { %322 = vsyncpa [#allocation6], 1 }
 0x136   :  { %323 = vsyncpa [#allocation4], 1 }

</bundles_post_ra>
